<compile_context>
chip_gen: v7x
topology: tpu7x:2x2x1
jax: 0.10.0
libtpu: 0.0.40
codegen_flags: <defaults>
</compile_context>

<pallas_src>
import math

import jax
import jax.numpy as jnp
from jax.experimental import pallas as pl
from jax.experimental.pallas import tpu as pltpu

_SUBLANE = 8


def _erf_f32(z):
    """Abramowitz & Stegun 7.1.26 rational erf approximation (|err| <= 1.5e-7).

    Uses only exp / mul / add / select / divide, which all lower cleanly in
    Mosaic (lax.erf has no guaranteed Pallas-TPU lowering)."""
    a1 = 0.254829592
    a2 = -0.284496736
    a3 = 1.421413741
    a4 = -1.453152027
    a5 = 1.061405429
    p = 0.3275911
    sign = jnp.where(z >= 0.0, 1.0, -1.0)
    za = jnp.abs(z)
    t = 1.0 / (1.0 + p * za)
    poly = ((((a5 * t + a4) * t + a3) * t + a2) * t + a1) * t
    return sign * (1.0 - poly * jnp.exp(-za * za))


def _gelu_exact(x):
    # PyTorch nn.GELU() default = exact (erf) formulation; computed in f32.
    return 0.5 * x * (1.0 + _erf_f32(x * (1.0 / math.sqrt(2.0))))


def _mlp_kernel(x_ref, w1_ref, b1_ref, w2_ref, b2_ref, out_ref, acc_ref):
    h_idx = pl.program_id(1)

    @pl.when(h_idx == 0)
    def _init():
        acc_ref[...] = jnp.zeros_like(acc_ref)

    # fc1 for this H slab: MXU consumes the caller's dtype (bf16 or f32),
    # accumulates in f32.
    h = jnp.dot(x_ref[...], w1_ref[...], preferred_element_type=jnp.float32)
    h = _gelu_exact(h + b1_ref[...].astype(jnp.float32))      # (tile_m, tile_h) f32
    # TODO(synk): dropout (p=0.0 / eval mode) is an identity and is omitted.

    # fc2 partial sum for this H slab, accumulated in f32 scratch.
    acc_ref[...] += jnp.dot(h.astype(w2_ref.dtype), w2_ref[...],
                            preferred_element_type=jnp.float32)

    @pl.when(h_idx == pl.num_programs(1) - 1)
    def _finalize():
        out_ref[...] = (acc_ref[...] + b2_ref[...].astype(jnp.float32)
                        ).astype(out_ref.dtype)               # single full-tile store


def _pick_tile_m(m):
    """Fixed, MXU-friendly row tile; never degenerates to tiny tiles."""
    if m >= 256:
        return 256
    return max(_SUBLANE, pl.cdiv(m, _SUBLANE) * _SUBLANE)


def _pick_tile_h(hidden, c, w_itemsize):
    """Full-H (weights VMEM-resident, DMA'd once) when small; else 128-multiple
    H slabs so VMEM use is independent of the hidden size (v7x: 64 MiB VMEM)."""
    resident_bytes = 2 * (2 * c * hidden + hidden + c) * w_itemsize  # double-buffered
    if resident_bytes <= (20 << 20):
        return hidden
    for cand in (1024, 512, 384, 256, 128):
        if hidden % cand == 0:
            return cand
    return hidden  # ragged hidden dim: fall back to fully resident weights


def _vmem_limit_bytes(tile_m, tile_h, c, x_itemsize, w_itemsize, out_itemsize):
    buf = 2  # default double-buffering on every pipelined operand
    total = (buf * tile_m * c * x_itemsize          # x tile
             + buf * c * tile_h * w_itemsize        # w1 slab
             + buf * tile_h * w_itemsize            # b1 slab
             + buf * tile_h * c * w_itemsize        # w2 slab
             + buf * c * w_itemsize                 # b2
             + buf * tile_m * c * out_itemsize      # out tile
             + tile_m * c * 4                       # f32 accumulator scratch
             + tile_m * tile_h * 4)                 # f32 GELU intermediate
    total = int(total * 1.5) + (4 << 20)            # headroom for compiler temps
    # Cap so the same configuration fits v7x's 64 MiB physical VMEM; always
    # safe on v5e/v6e (128 MiB).
    return int(min(total, 56 << 20))


def mlp(x, params):
    """x: (B, N, C).  params: w1 (C,H), b1 (1,H), w2 (H,C), b2 (1,C).

    Computes y = gelu(x @ w1 + b1) @ w2 + b2 (PyTorch Linear weights already
    transposed to (in, out) layout)."""
    B, N, C = x.shape
    w1, b1, w2, b2 = params["w1"], params["b1"], params["w2"], params["b2"]
    H = w1.shape[1]
    assert w1.shape == (C, H) and b1.shape == (1, H)
    assert w2.shape == (H, C) and b2.shape == (1, C)

    M = B * N
    x2 = x.reshape(M, C)

    tile_m = _pick_tile_m(M)
    m_pad = pl.cdiv(M, tile_m) * tile_m
    if m_pad != M:
        x2 = jnp.pad(x2, ((0, m_pad - M), (0, 0)))  # padded rows sliced off below

    tile_h = _pick_tile_h(H, C, w1.dtype.itemsize)
    grid = (m_pad // tile_m, H // tile_h)

    cost = pl.CostEstimate(
        flops=4 * m_pad * C * H,                    # two (M,C)x(C,H)-sized GEMMs
        transcendentals=m_pad * H,                  # one exp per hidden element
        bytes_accessed=(x2.size * x2.dtype.itemsize
                        + w1.size * w1.dtype.itemsize
                        + b1.size * b1.dtype.itemsize
                        + w2.size * w2.dtype.itemsize
                        + b2.size * b2.dtype.itemsize
                        + m_pad * C * x.dtype.itemsize),
    )

    out2 = pl.pallas_call(
        _mlp_kernel,
        out_shape=jax.ShapeDtypeStruct((m_pad, C), x.dtype),
        grid_spec=pltpu.PrefetchScalarGridSpec(
            num_scalar_prefetch=0,
            grid=grid,
            in_specs=[
                pl.BlockSpec((tile_m, C), lambda i, h: (i, 0)),   # x row block
                pl.BlockSpec((C, tile_h), lambda i, h: (0, h)),   # w1 slab
                pl.BlockSpec((1, tile_h), lambda i, h: (0, h)),   # b1 slab
                pl.BlockSpec((tile_h, C), lambda i, h: (h, 0)),   # w2 slab
                pl.BlockSpec((1, C), lambda i, h: (0, 0)),        # b2 (resident)
            ],
            out_specs=pl.BlockSpec((tile_m, C), lambda i, h: (i, 0)),
            scratch_shapes=[pltpu.VMEM((tile_m, C), jnp.float32)],
        ),
        compiler_params=pltpu.CompilerParams(
            dimension_semantics=("parallel", "arbitrary"),
            vmem_limit_bytes=_vmem_limit_bytes(
                tile_m, tile_h, C,
                x2.dtype.itemsize, w1.dtype.itemsize, x.dtype.itemsize),
        ),
        cost_estimate=cost,
    )(x2, w1, b1, w2, b2)

    if m_pad != M:
        out2 = out2[:M]
    return out2.reshape(B, N, C)


def mlp_reference(x, params):
    """Pure-JAX reference mirroring the PyTorch forward (eval mode, dropout=0)."""
    h = x @ params["w1"] + params["b1"]
    h = jax.nn.gelu(h, approximate=False)   # exact erf GELU, like nn.GELU()
    return h @ params["w2"] + params["b2"]


if __name__ == "__main__":
    # Small shapes consistent with the module: B=2, N=8 tokens,
    # in_features C=32, hidden_features H=128 (ViT-style 4x expansion).
    B, N, C, Hd = 2, 8, 32, 128

    key = jax.random.PRNGKey(0)
    keys = jax.random.split(key, 6)

    x = jax.random.normal(keys[0], (B, N, C), dtype=jnp.float32)
    params = {
        "w1": 0.1 * jax.random.normal(keys[1], (C, Hd), dtype=jnp.float32),
        "b1": 0.1 * jax.random.normal(keys[2], (1, Hd), dtype=jnp.float32),
        "w2": 0.1 * jax.random.normal(keys[3], (Hd, C), dtype=jnp.float32),
        "b2": 0.1 * jax.random.normal(keys[4], (1, C), dtype=jnp.float32),
    }

    # f32 path (exact check against the reference).
    out = jax.block_until_ready(mlp(x, params))
    ref = mlp_reference(x, params)
    assert out.shape == (B, N, C)
    assert jnp.allclose(out, ref, atol=1e-4, rtol=1e-4), "f32 mismatch vs reference"

    # bf16 fast path: bf16 operands straight into the MXU, f32 accumulation.
    xb = x.astype(jnp.bfloat16)
    pb = {k: v.astype(jnp.bfloat16) for k, v in params.items()}
    out_bf16 = jax.block_until_ready(mlp(xb, pb))
    assert out_bf16.shape == (B, N, C)
    assert jnp.allclose(out_bf16.astype(jnp.float32), ref, atol=5e-2, rtol=5e-2), \
        "bf16 mismatch vs reference"

    # Ragged token count (M not a multiple of the row tile) exercises the
    # pad-and-slice path (ViT's N=197 style).
    x_r = jax.random.normal(keys[5], (1, 7, C), dtype=jnp.float32)
    out_r = jax.block_until_ready(mlp(x_r, params))
    ref_r = mlp_reference(x_r, params)
    assert jnp.allclose(out_r, ref_r, atol=1e-4, rtol=1e-4), "ragged-M mismatch"

    print("KERNEL_OK")
</pallas_src>

<mosaic_0001>
module attributes {stable_mosaic.version = 11 : i64} {
  func.func @_mlp_kernel(%arg0: i32, %arg1: i32, %arg2: memref<16x32xf32, #tpu.memory_space<vmem>>, %arg3: memref<32x128xf32, #tpu.memory_space<vmem>>, %arg4: memref<1x128xf32, #tpu.memory_space<vmem>>, %arg5: memref<128x32xf32, #tpu.memory_space<vmem>>, %arg6: memref<1x32xf32, #tpu.memory_space<vmem>>, %arg7: memref<16x32xf32, #tpu.memory_space<vmem>>, %arg8: memref<16x32xf32, #tpu.memory_space<vmem>>) attributes {dimension_semantics = [#tpu.dimension_semantics<parallel>, #tpu.dimension_semantics<arbitrary>], iteration_bounds = array<i64: 1, 1>, scalar_prefetch = 0 : i64, scratch_operands = 1 : i64, tpu.core_type = #tpu.core_type<tc>, window_params = [{transform_indices = @transform_0, window_bounds = array<i64: 16, 32>}, {transform_indices = @transform_1, window_bounds = array<i64: 32, 128>}, {transform_indices = @transform_2, window_bounds = array<i64: 1, 128>}, {transform_indices = @transform_3, window_bounds = array<i64: 128, 32>}, {pipeline_mode = #tpu.pipeline_mode<synchronous>, transform_indices = @transform_4, window_bounds = array<i64: 1, 32>}, {transform_indices = @transform_5, window_bounds = array<i64: 16, 32>}]} {
    %c0_i32 = arith.constant 0 : i32
    %0 = arith.cmpi eq, %arg1, %c0_i32 : i32
    %1 = arith.extui %0 : i1 to i32
    %c0_i32_0 = arith.constant 0 : i32
    %2 = arith.cmpi ne, %1, %c0_i32_0 : i32
    scf.if %2 {
      %cst_31 = arith.constant 0.000000e+00 : f32
      %58 = vector.broadcast %cst_31 : f32 to vector<16x32xf32>
      %c0_32 = arith.constant 0 : index
      %c0_33 = arith.constant 0 : index
      %59 = vector.load %arg8[%c0_32, %c0_33] : memref<16x32xf32, #tpu.memory_space<vmem>>, vector<16x32xf32>
      tpu.vector_store %arg8[%c0_32, %c0_33], %58 {strides = array<i32>} : memref<16x32xf32, #tpu.memory_space<vmem>>, vector<16x32xf32>,
    } else {
    }
    %c0 = arith.constant 0 : index
    %c0_1 = arith.constant 0 : index
    %3 = vector.load %arg2[%c0, %c0_1] : memref<16x32xf32, #tpu.memory_space<vmem>>, vector<16x32xf32>
    %c0_2 = arith.constant 0 : index
    %c0_3 = arith.constant 0 : index
    %4 = vector.load %arg3[%c0_2, %c0_3] : memref<32x128xf32, #tpu.memory_space<vmem>>, vector<32x128xf32>
    %cst = arith.constant dense<0.000000e+00> : vector<16x128xf32>
    %5 = tpu.matmul %3, %4, %cst {dimension_numbers = #tpu.dot_dimension_numbers<[1], [0], [0], [1], [0, 0, 1, 1], [], []>} : vector<16x32xf32>, vector<32x128xf32>, vector<16x128xf32> -> vector<16x128xf32>
    %c0_4 = arith.constant 0 : index
    %c0_5 = arith.constant 0 : index
    %6 = vector.load %arg4[%c0_4, %c0_5] : memref<1x128xf32, #tpu.memory_space<vmem>>, vector<1x128xf32>
    %7 = vector.broadcast %6 : vector<1x128xf32> to vector<16x128xf32>
    %8 = arith.addf %5, %7 : vector<16x128xf32>
    %cst_6 = arith.constant 5.000000e-01 : f32
    %9 = vector.broadcast %cst_6 : f32 to vector<16x128xf32>
    %10 = arith.mulf %9, %8 : vector<16x128xf32>
    %cst_7 = arith.constant 0.707106769 : f32
    %11 = vector.broadcast %cst_7 : f32 to vector<16x128xf32>
    %12 = arith.mulf %8, %11 : vector<16x128xf32>
    %cst_8 = arith.constant 0.000000e+00 : f32
    %13 = vector.broadcast %cst_8 : f32 to vector<16x128xf32>
    %14 = arith.cmpf oge, %12, %13 : vector<16x128xf32>
    %cst_9 = arith.constant 1.000000e+00 : f32
    %cst_10 = arith.constant -1.000000e+00 : f32
    %15 = vector.broadcast %cst_9 : f32 to vector<16x128xf32>
    %16 = vector.broadcast %cst_10 : f32 to vector<16x128xf32>
    %17 = arith.select %14, %15, %16 : vector<16x128xi1>, vector<16x128xf32>
    %18 = math.absf %12 : vector<16x128xf32>
    %cst_11 = arith.constant 0.327591091 : f32
    %19 = vector.broadcast %cst_11 : f32 to vector<16x128xf32>
    %20 = arith.mulf %19, %18 : vector<16x128xf32>
    %cst_12 = arith.constant 1.000000e+00 : f32
    %21 = vector.broadcast %cst_12 : f32 to vector<16x128xf32>
    %22 = arith.addf %21, %20 : vector<16x128xf32>
    %cst_13 = arith.constant 1.000000e+00 : f32
    %23 = vector.broadcast %cst_13 : f32 to vector<16x128xf32>
    %24 = arith.divf %23, %22 : vector<16x128xf32>
    %cst_14 = arith.constant 1.06140542 : f32
    %25 = vector.broadcast %cst_14 : f32 to vector<16x128xf32>
    %26 = arith.mulf %25, %24 : vector<16x128xf32>
    %cst_15 = arith.constant -1.45315206 : f32
    %27 = vector.broadcast %cst_15 : f32 to vector<16x128xf32>
    %28 = arith.addf %26, %27 : vector<16x128xf32>
    %29 = arith.mulf %28, %24 : vector<16x128xf32>
    %cst_16 = arith.constant 1.42141378 : f32
    %30 = vector.broadcast %cst_16 : f32 to vector<16x128xf32>
    %31 = arith.addf %29, %30 : vector<16x128xf32>
    %32 = arith.mulf %31, %24 : vector<16x128xf32>
    %cst_17 = arith.constant -0.284496725 : f32
    %33 = vector.broadcast %cst_17 : f32 to vector<16x128xf32>
    %34 = arith.addf %32, %33 : vector<16x128xf32>
    %35 = arith.mulf %34, %24 : vector<16x128xf32>
    %cst_18 = arith.constant 0.254829586 : f32
    %36 = vector.broadcast %cst_18 : f32 to vector<16x128xf32>
    %37 = arith.addf %35, %36 : vector<16x128xf32>
    %38 = arith.mulf %37, %24 : vector<16x128xf32>
    %cst_19 = arith.constant 0.000000e+00 : f32
    %39 = vector.broadcast %cst_19 : f32 to vector<16x128xf32>
    %40 = arith.subf %39, %18 : vector<16x128xf32>
    %41 = arith.mulf %40, %18 : vector<16x128xf32>
    %42 = math.exp %41 : vector<16x128xf32>
    %43 = arith.mulf %38, %42 : vector<16x128xf32>
    %cst_20 = arith.constant 1.000000e+00 : f32
    %44 = vector.broadcast %cst_20 : f32 to vector<16x128xf32>
    %45 = arith.subf %44, %43 : vector<16x128xf32>
    %46 = arith.mulf %17, %45 : vector<16x128xf32>
    %cst_21 = arith.constant 1.000000e+00 : f32
    %47 = vector.broadcast %cst_21 : f32 to vector<16x128xf32>
    %48 = arith.addf %47, %46 : vector<16x128xf32>
    %49 = arith.mulf %10, %48 : vector<16x128xf32>
    %c0_22 = arith.constant 0 : index
    %c0_23 = arith.constant 0 : index
    %50 = vector.load %arg8[%c0_22, %c0_23] : memref<16x32xf32, #tpu.memory_space<vmem>>, vector<16x32xf32>
    %c0_24 = arith.constant 0 : index
    %c0_25 = arith.constant 0 : index
    %51 = vector.load %arg5[%c0_24, %c0_25] : memref<128x32xf32, #tpu.memory_space<vmem>>, vector<128x32xf32>
    %cst_26 = arith.constant dense<0.000000e+00> : vector<16x32xf32>
    %52 = tpu.matmul %49, %51, %cst_26 {dimension_numbers = #tpu.dot_dimension_numbers<[1], [0], [0], [1], [0, 0, 1, 1], [], []>} : vector<16x128xf32>, vector<128x32xf32>, vector<16x32xf32> -> vector<16x32xf32>
    %53 = arith.addf %50, %52 : vector<16x32xf32>
    %c0_27 = arith.constant 0 : index
    %c0_28 = arith.constant 0 : index
    %54 = vector.load %arg8[%c0_27, %c0_28] : memref<16x32xf32, #tpu.memory_space<vmem>>, vector<16x32xf32>
    tpu.vector_store %arg8[%c0_27, %c0_28], %53 {strides = array<i32>} : memref<16x32xf32, #tpu.memory_space<vmem>>, vector<16x32xf32>,
    %c0_i32_29 = arith.constant 0 : i32
    %55 = arith.cmpi eq, %arg1, %c0_i32_29 : i32
    %56 = arith.extui %55 : i1 to i32
    %c0_i32_30 = arith.constant 0 : i32
    %57 = arith.cmpi ne, %56, %c0_i32_30 : i32
    scf.if %57 {
      %c0_31 = arith.constant 0 : index
      %c0_32 = arith.constant 0 : index
      %58 = vector.load %arg8[%c0_31, %c0_32] : memref<16x32xf32, #tpu.memory_space<vmem>>, vector<16x32xf32>
      %c0_33 = arith.constant 0 : index
      %c0_34 = arith.constant 0 : index
      %59 = vector.load %arg6[%c0_33, %c0_34] : memref<1x32xf32, #tpu.memory_space<vmem>>, vector<1x32xf32>
      %60 = vector.broadcast %59 : vector<1x32xf32> to vector<16x32xf32>
      %61 = arith.addf %58, %60 : vector<16x32xf32>
      %c0_35 = arith.constant 0 : index
      %c0_36 = arith.constant 0 : index
      %62 = vector.load %arg7[%c0_35, %c0_36] : memref<16x32xf32, #tpu.memory_space<vmem>>, vector<16x32xf32>
      tpu.vector_store %arg7[%c0_35, %c0_36], %61 {strides = array<i32>} : memref<16x32xf32, #tpu.memory_space<vmem>>, vector<16x32xf32>,
    } else {
    }
    return
  }
  func.func @transform_0(%arg0: i32, %arg1: i32) -> (i32, i32) {
    %c0_i32 = arith.constant 0 : i32
    %c0_i32_0 = arith.constant 0 : i32
    return %arg0, %c0_i32 : i32, i32
  }
  func.func @transform_1(%arg0: i32, %arg1: i32) -> (i32, i32) {
    %c0_i32 = arith.constant 0 : i32
    %c0_i32_0 = arith.constant 0 : i32
    return %c0_i32, %arg1 : i32, i32
  }
  func.func @transform_2(%arg0: i32, %arg1: i32) -> (i32, i32) {
    %c0_i32 = arith.constant 0 : i32
    %c0_i32_0 = arith.constant 0 : i32
    return %c0_i32, %arg1 : i32, i32
  }
  func.func @transform_3(%arg0: i32, %arg1: i32) -> (i32, i32) {
    %c0_i32 = arith.constant 0 : i32
    %c0_i32_0 = arith.constant 0 : i32
    return %arg1, %c0_i32 : i32, i32
  }
  func.func @transform_4(%arg0: i32, %arg1: i32) -> (i32, i32) {
    %c0_i32 = arith.constant 0 : i32
    %c0_i32_0 = arith.constant 0 : i32
    %c0_i32_1 = arith.constant 0 : i32
    return %c0_i32, %c0_i32_0 : i32, i32
  }
  func.func @transform_5(%arg0: i32, %arg1: i32) -> (i32, i32) {
    %c0_i32 = arith.constant 0 : i32
    %c0_i32_0 = arith.constant 0 : i32
    return %arg0, %c0_i32 : i32, i32
  }
}

</mosaic_0001>

<bundles_post_ra>
// kernel: tpu_custom_call.1
= control target key start
LH: loop header
LB: loop body
LE: loop exit
PB: predicated region body
PF: predicated region fallthrough
CT: control target
= control target key end

     0   :  { %vm25_vm0 = vcmask 261120   ;;  %s584_s0 = inlined_call_operand.vmem [shape: f32[16,32], index: 0, kind: input, shape index: {}]   ;;  %s585_s1 = inlined_call_operand.vmem [shape: f32[32,128], index: 1, kind: input, shape index: {}]   ;;  %s586_s2 = inlined_call_operand.vmem [shape: f32[1,128], index: 2, kind: input, shape index: {}]   ;;  %s587_s3 = inlined_call_operand.vmem [shape: f32[128,32], index: 3, kind: input, shape index: {}]   ;;  %s588_s4 = inlined_call_operand.vmem [shape: f32[1,32], index: 4, kind: input, shape index: {}]   ;;  %s589_s5 = inlined_call_operand.hbm [shape: f32[16,32], index: 5, kind: output, shape index: {}]  }
   0x1   :  { %v30_v0 = vld [vmem:[%s585_s1] sm:$0xff]  ;;  %v31_v1 = vld [vmem:[%s585_s1 + $0x8] sm:$0xff]  ;;  %v32_v2 = vld [vmem:[%s585_s1 + $0x10] sm:$0xff] }
   0x2   :  { %v380_v3 = vpack.c.bf16 %v31_v1, %v30_v0  ;;  %v33_v4 = vld [vmem:[%s585_s1 + $0x18] sm:$0xff]  ;;  %v28_v5 = vld [vmem:[%s584_s0] sm:$0xff] }
   0x3   :  { %v384_v6 = vpack.c.bf16 %v33_v4, %v32_v2  ;;  %342 = vmatprep.mubr.msk.f32.mxu0 %vm25_vm0, %v28_v5 }
   0x4   :  { %10 = vsyncpa [#allocation4], 0  ;;  %381 = vmatprep.subr.bf16.mxu0 %v380_v3  ;;  %v29_v7 = vld [vmem:[%s584_s0 + $0x8] sm:$0xff]  ;;  %v179_v8 = vld [vmem:[%s587_s3] sm:$0xff]  ;;  %v457_v32 = vmov 0.0   ;;  %s459_s11 = smov [#allocation3]  }
   0x5   :  { %383 = vmatpush3.bf16.msra.mxu0 %v380_v3  ;;  %v180_v9 = vld [vmem:[%s587_s3 + $0x8] sm:$0xff]  ;;  %v181_v10 = vld [vmem:[%s587_s3 + $0x10] sm:$0xff]  ;;  %v182_v12 = vld [vmem:[%s587_s3 + $0x18] sm:$0xff]  ;;  %27 = vst.msk [vmem:[#allocation2 + $0x8] sm:$0xff] %vm25_vm0, %v457_v32  ;;  %s295_s0 = sshll.u32 %s459_s11, 4  ;;  %s296_s0 = int_to_ptr.vmem [resolvable:$true] %s295_s0 }
   0x6   :  { %385 = vmatprep.subr.bf16.mxu0 %v384_v6  ;;  %v388_v11 = vpack.c.bf16 %v180_v9, %v179_v8  ;;  %v392_v13 = vpack.c.bf16 %v182_v12, %v181_v10  ;;  %v183_v14 = vld [vmem:[%s587_s3 + $0x20] sm:$0xff]  ;;  %v184_v15 = vld [vmem:[%s587_s3 + $0x28] sm:$0xff]  ;;  %v185_v17 = vld [vmem:[%s587_s3 + $0x30] sm:$0xff]  ;;  %26 = vst.msk [vmem:[#allocation2] sm:$0xff] %vm25_vm0, %v457_v32  ;;  %s433_s12 = scalar_lea.vmem %s296_s0, 256  ;;  %p438_p1 = scmp.lt.s32.totalorder %s296_s0, %s296_s0 }
   0x7   :  { %v396_v16 = vpack.c.bf16 %v184_v15, %v183_v14  ;;  %v186_v18 = vld [vmem:[%s587_s3 + $0x38] sm:$0xff]  ;;  %v187_v20 = vld [vmem:[%s587_s3 + $0x40] sm:$0xff]  ;;  %v188_v21 = vld [vmem:[%s587_s3 + $0x48] sm:$0xff]  ;;  %p434_p0 = scmp.ne.s32.totalorder %s296_s0, %s433_s12  ;;  %p439_p2 = scmp.lt.s32.totalorder %s433_s12, %s433_s12 }
   0x8   :  { %389 = vmatprep.subr.bf16.mxu1 %v388_v11  ;;  %v400_v19 = vpack.c.bf16 %v186_v18, %v185_v17  ;;  %v404_v22 = vpack.c.bf16 %v188_v21, %v187_v20  ;;  %v189_v23 = vld [vmem:[%s587_s3 + $0x50] sm:$0xff]  ;;  %v190_v24 = vld [vmem:[%s587_s3 + $0x58] sm:$0xff]  ;;  %v191_v26 = vld [vmem:[%s587_s3 + $0x60] sm:$0xff] }
   0x9   :  { %387 = vmatpush3.bf16.msra.mxu0 %v384_v6  ;;  %391 = vmatpush3.bf16.msra.mxu1 %v388_v11  ;;  %v408_v25 = vpack.c.bf16 %v190_v24, %v189_v23  ;;  %v192_v27 = vld [vmem:[%s587_s3 + $0x68] sm:$0xff]  ;;  %v193_v29 = vld [vmem:[%s587_s3 + $0x70] sm:$0xff]  ;;  %v194_v30 = vld [vmem:[%s587_s3 + $0x78] sm:$0xff]  ;;  %p440_p3 = por %p439_p2, %p438_p1 }
   0xa   :  { %393 = vmatprep.subr.bf16.mxu1 %v392_v13  ;;  %v412_v28 = vpack.c.bf16 %v192_v27, %v191_v26  ;;  %v416_v31 = vpack.c.bf16 %v194_v30, %v193_v29  ;;  %v306_v33 = vld [vmem:[%s586_s2] ss:$0 sm:$0xff] }
   0xb   :  { %p441_p4 = pnand %p440_p3, %p434_p0 }
   0xc   :  { %343 = vmatmul.mubr.msk.f32.vlgmr.msra.gmra.mrb[0].mxu0 %vm25_vm0, %v29_v7 }
   0xd   :  { %395 = vmatpush3.bf16.msra.mxu1 %v392_v13  ;;  %v458_v13 = vmov -1.0   ;;  %v177_v26 = vld [vmem:[#allocation2] sm:$0xff] }
   0xe   :  { %397 = vmatprep.subr.bf16.mxu1 %v396_v16 }
  0x11   :  { %399 = vmatpush3.bf16.msra.mxu1 %v396_v16 }
  0x12   :  { %401 = vmatprep.subr.bf16.mxu1 %v400_v19 }
  0x15   :  { %403 = vmatpush3.bf16.msra.mxu1 %v400_v19 }
  0x16   :  { %405 = vmatprep.subr.bf16.mxu1 %v404_v22 }
  0x19   :  { %407 = vmatpush3.bf16.msra.mxu1 %v404_v22 }
  0x1a   :  { %409 = vmatprep.subr.bf16.mxu1 %v408_v25 }
  0x1d   :  { %411 = vmatpush3.bf16.msra.mxu1 %v408_v25  ;;  %v178_v25 = vld [vmem:[#allocation2 + $0x8] sm:$0xff] }
  0x1e   :  { %413 = vmatprep.subr.bf16.mxu1 %v412_v28 }
  0x21   :  { %415 = vmatpush3.bf16.msra.mxu1 %v412_v28 }
  0x22   :  { %417 = vmatprep.subr.bf16.mxu1 %v416_v31 }
  0x25   :  { %419 = vmatpush3.bf16.msra.mxu1 %v416_v31  ;;  %v309_v31 = vld [vmem:[%s588_s4] ss:$0 sm:$0xff] }
  0xdf   :  { %v344_v34 = vpop.f32.mrb[0].mxu0 }
  0xe0   :  { %v120_v35 = vadd.f32 %v344_v34, %v306_v33  ;;  %v114_v36 = vpop.f32.mrb[1].mxu0 }
  0xe1   :  { %v115_v37 = vadd.f32 %v306_v33, %v114_v36 }
  0xe2   :  { %v126_v38 = vmul.f32 0.70710677, %v120_v35  ;;  %v124_v22 = vmul.f32 0.5, %v120_v35 }
  0xe3   :  { %v125_v39 = vmul.f32 0.70710677, %v115_v37  ;;  %v123_v20 = vmul.f32 0.5, %v115_v37 }
  0xe4   :  { %v132_v40 = vand.u32 2147483647, %v126_v38  ;;  %vm128_vm1 = vcmp.ge.f32.partialorder %v126_v38, 0.0 }
  0xe5   :  { %v131_v41 = vand.u32 2147483647, %v125_v39  ;;  %vm127_vm2 = vcmp.ge.f32.partialorder %v125_v39, 0.0  ;;  %v130_v14 = vsel %vm128_vm1, 1.0, %v458_v13 }
  0xe6   :  { %v134_v42 = vmul.f32 0.3275911, %v132_v40  ;;  %v160_v46 = vsub.f32 0.0, %v132_v40  ;;  %v129_v16 = vsel %vm127_vm2, 1.0, %v458_v13 }
  0xe7   :  { %v133_v43 = vmul.f32 0.3275911, %v131_v41  ;;  %v159_v47 = vsub.f32 0.0, %v131_v41 }
  0xe8   :  { %v136_v44 = vadd.f32 1.0, %v134_v42  ;;  %v162_v49 = vmul.f32 %v160_v46, %v132_v40 }
  0xe9   :  { %v135_v45 = vadd.f32 1.0, %v133_v43  ;;  %v161_v51 = vmul.f32 %v159_v47, %v131_v41 }
  0xea   :  { %425 = vrcp.f32 %v136_v44  ;;  %v165_v55 = vmul.f32 1.442695, %v162_v49 }
  0xeb   :  { %427 = vrcp.f32 %v135_v45  ;;  %v163_v57 = vmul.f32 1.442695, %v161_v51 }
  0xec   :  { %429 = vpow2.f32 %v165_v55 }
  0xed   :  { %431 = vpow2.f32 %v163_v57 }
  0xf4   :  { %v426_v48 = vpop.eup %425 }
  0xf5   :  { %v428_v50 = vpop.eup %427  ;;  %v142_v52 = vmul.f32 1.0614054, %v426_v48 }
  0xf6   :  { %v141_v53 = vmul.f32 1.0614054, %v428_v50  ;;  %v430_v7 = vpop.eup %429 }
  0xf7   :  { %v144_v54 = vadd.f32 -1.4531521, %v142_v52  ;;  %v432_v9 = vpop.eup %431 }
  0xf8   :  { %v143_v56 = vadd.f32 -1.4531521, %v141_v53 }
  0xf9   :  { %v146_v58 = vmul.f32 %v426_v48, %v144_v54 }
  0xfa   :  { %v145_v59 = vmul.f32 %v428_v50, %v143_v56 }
  0xfb   :  { %v148_v60 = vadd.f32 1.4214138, %v146_v58 }
  0xfc   :  { %v147_v61 = vadd.f32 1.4214138, %v145_v59 }
  0xfd   :  { %v150_v62 = vmul.f32 %v426_v48, %v148_v60 }
  0xfe   :  { %v149_v63 = vmul.f32 %v428_v50, %v147_v61 }
  0xff   :  { %v152_v0 = vadd.f32 -0.28449672, %v150_v62 }
 0x100   :  { %v151_v1 = vadd.f32 -0.28449672, %v149_v63 }
 0x101   :  { %v154_v2 = vmul.f32 %v426_v48, %v152_v0 }
 0x102   :  { %v153_v3 = vmul.f32 %v428_v50, %v151_v1 }
 0x103   :  { %v156_v4 = vadd.f32 0.2548296, %v154_v2 }
 0x104   :  { %v155_v5 = vadd.f32 0.2548296, %v153_v3 }
 0x105   :  { %v158_v6 = vmul.f32 %v426_v48, %v156_v4 }
 0x106   :  { %v157_v8 = vmul.f32 %v428_v50, %v155_v5 }
 0x107   :  { %v168_v10 = vmul.f32 %v430_v7, %v158_v6 }
 0x108   :  { %v167_v11 = vmul.f32 %v432_v9, %v157_v8 }
 0x109   :  { %v170_v12 = vsub.f32 1.0, %v168_v10 }
 0x10a   :  { %v169_v15 = vsub.f32 1.0, %v167_v11 }
 0x10b   :  { %v172_v17 = vmul.f32 %v170_v12, %v130_v14 }
 0x10c   :  { %v171_v18 = vmul.f32 %v169_v15, %v129_v16 }
 0x10d   :  { %v174_v19 = vadd.f32 1.0, %v172_v17 }
 0x10e   :  { %v173_v21 = vadd.f32 1.0, %v171_v18 }
 0x10f   :  { %v176_v24 = vmul.f32 %v174_v19, %v124_v22 }
 0x110   :  { %v175_v23 = vmul.f32 %v173_v21, %v123_v20 }
 0x112   :  { %377 = vmatprep.mubr.f32.mxu1 %v175_v23 }
 0x113   :  { %378 = vmatmul.mubr.f32.vlgmr.msra.gmra.mrb[0].mxu1 %v176_v24 }
 0x1e6   :  { %v379_v27 = vpop.f32.mrb[0].mxu1 }
 0x1e7   :  { %v271_v28 = vadd.f32 %v379_v27, %v178_v25  ;;  %v261_v29 = vpop.f32.mrb[1].mxu1 }
 0x1e8   :  { %v270_v30 = vadd.f32 %v261_v29, %v177_v26 }
 0x1e9   :  { %273 = vst.msk [vmem:[#allocation2 + $0x8] sm:$0xff] %vm25_vm0, %v271_v28 }
 0x1ea   :  { %272 = vst.msk [vmem:[#allocation2] sm:$0xff] %vm25_vm0, %v270_v30 }
 0x1f0   :  { %v278_v32 = vld [vmem:[#allocation2 + $0x8] sm:$0xff] }
 0x1f1   :  { %v277_v33 = vld [vmem:[#allocation2] sm:$0xff]  ;;  %v287_v34 = vadd.f32 %v309_v31, %v278_v32 }
 0x1f2   :  { %v286_v35 = vadd.f32 %v309_v31, %v277_v33 }
 0x1f3   :  { %289 = vst.msk [vmem:[#allocation3 + $0x8] sm:$0xff] %vm25_vm0, %v287_v34 }
 0x1f4   :  { %288 = vst.msk [vmem:[#allocation3] sm:$0xff] %vm25_vm0, %v286_v35 }
 0x1f5   :  { %444 = shalt.err (!%p441_p4)
}
 0x1f6   :  { %s445_s14 = scalar_lea.hbm %s589_s5, 256 }
 0x1f7   :  { %p446_p5 = scmp.ne.s32.totalorder %s589_s5, %s445_s14  ;;  %p449_p6 = scmp.lt.u32.totalorder %s445_s14, %s589_s5 }
 0x1f9   :  { %p451_p7 = pnand %p449_p6, %p446_p5 }
 0x1fb   :  { %454 = shalt.err (!%p451_p7)
}
 0x1fc   :  { %s460_s19 = smov 128   ;;  %s461_s20 = smov 8  }
 0x1fd   :  { %301 = dma.vmem_to_hbm [thread:$0]  %s296_s0, 256, %s589_s5, [#allocation4], %s460_s19, %s460_s19, %s461_s20  }
 0x1fe   :  { %455 = dma.done.wait [#allocation4], 256  }
 0x1ff   :  { %456 = vsyncadd [#allocation4], 4294967040 }
 0x200   :  { %305 = vsyncpa [#allocation4], 1 }

</bundles_post_ra>
